<compile_context>
chip_gen: v5e
topology: v5e:2x2
jax: 0.10.0
libtpu: 0.0.40
codegen_flags: <defaults>
</compile_context>

<pallas_src>
import math

import jax
import jax.numpy as jnp
import numpy as np
from jax import lax
from jax.experimental import pallas as pl
from jax.experimental.pallas import tpu as pltpu


def _gaussian_1d(window_size: int, sigma: float) -> np.ndarray:
    g = np.array(
        [math.exp(-((x - window_size // 2) ** 2) / float(2 * sigma**2))
         for x in range(window_size)],
        dtype=np.float64,
    )
    return g / g.sum()


def _band_matrix(n: int, window_size: int, sigma: float) -> np.ndarray:
    """(n, n) banded matrix implementing a zero-padded 'same' 1-D Gaussian conv.

    M[i, k] = g[k - i + pad] for |k - i| <= pad, else 0.  Symmetric, so it can
    be used both as the left (vertical) and right (horizontal) factor.
    """
    g = _gaussian_1d(window_size, sigma)
    pad = window_size // 2
    m = np.zeros((n, n), dtype=np.float32)
    for off in range(-pad, pad + 1):
        lo = max(0, -off)
        hi = min(n, n - off)
        if hi <= lo:
            continue
        idx = np.arange(lo, hi)
        m[idx, idx + off] = np.float32(g[off + pad])
    return m


def _pick_cblk(num_planes: int, W: int) -> int:
    """Planes packed along the lane axis per grid step.

    Constraints: cblk divides num_planes; block lane width cblk*W is a
    multiple of 128 (or the full array width); keep it <= 256 (~one MXU
    K-pass); and prefer grid_n >= 2 when we can do so without dropping below
    one full 128-lane vreg width.
    """
    divisors = [d for d in range(1, num_planes + 1) if num_planes % d == 0]
    legal = [d for d in divisors if (d * W) % 128 == 0] or [num_planes]
    small = [d for d in legal if d * W <= 256] or [min(legal)]
    multi = [d for d in small if d < num_planes and d * W >= 128]
    if multi:
        return max(multi)
    return max(small)


def _vmem_limit_bytes() -> int:
    """Generation-aware scoped-VMEM limit (leaves >=50% headroom everywhere)."""
    try:
        cap = pltpu.get_tpu_info().vmem_capacity_bytes
    except Exception:  # off-device tracing / API variations: safe default
        return 32 * 1024 * 1024
    return int(min(cap // 2, 64 * 1024 * 1024))


def _ssim_kernel(x1_ref, x2_ref, gv5_ref, ghb_ref, out_ref):
    x1 = x1_ref[...].astype(jnp.float32)      # (H, L): cblk planes, lane-packed
    x2 = x2_ref[...].astype(jnp.float32)
    h = x1.shape[0]

    # All five maps stacked along sublanes -> ONE pair of MXU matmuls blurs
    # everything at once (lane width L stays >=128, sublane height is 5H).
    slab = jnp.concatenate([x1, x2, x1 * x1, x2 * x2, x1 * x2], axis=0)  # (5H, L)

    # Separable "same" Gaussian conv as two matmuls.  The block-diagonal
    # structure of Ghb keeps planes (lanes) separate; the block-diagonal
    # structure of Gv5 keeps the five maps (sublanes) separate.
    sh = jnp.dot(slab, ghb_ref[...], preferred_element_type=jnp.float32)    # horizontal
    blur = jnp.dot(gv5_ref[...], sh, preferred_element_type=jnp.float32)    # vertical

    mu1 = blur[0:h]
    mu2 = blur[h:2 * h]
    e11 = blur[2 * h:3 * h]
    e22 = blur[3 * h:4 * h]
    e12 = blur[4 * h:5 * h]

    mu1_sq = mu1 * mu1
    mu2_sq = mu2 * mu2
    mu1_mu2 = mu1 * mu2
    sigma1_sq = e11 - mu1_sq
    sigma2_sq = e22 - mu2_sq
    sigma12 = e12 - mu1_mu2

    c1 = jnp.float32(0.01**2)
    c2 = jnp.float32(0.03**2)
    num = (2.0 * mu1_mu2 + c1) * (2.0 * sigma12 + c2)
    den = (mu1_sq + mu2_sq + c1) * (sigma1_sq + sigma2_sq + c2)

    # Approximate reciprocal on the (otherwise idle) EUP slot, refined with one
    # Newton-Raphson step (two cheap VPU ops) to stay well within tolerance.
    r = pl.reciprocal(den, approx=True)
    r = r * (2.0 - den * r)
    ssim_map = num * r

    # Per-step partial sum, written as its own lane-dense (8,128) tile.
    partial = jnp.sum(ssim_map)
    out_ref[...] = jnp.broadcast_to(partial, out_ref.shape).astype(out_ref.dtype)


def ssim_loss_pallas(img1, img2, window_size=11, size_average=True):
    """1 - SSIM(img1, img2), NCHW layout.  Only size_average=True implemented."""
    if not size_average:
        # TODO(synk): size_average=False (per-image mean) not implemented; module default is True.
        raise NotImplementedError("size_average=False not implemented")

    B, C, H, W = img1.shape
    num_planes = B * C
    cblk = _pick_cblk(num_planes, W)
    grid_n = num_planes // cblk
    lblk = cblk * W

    # Lane-pack the planes: (H, num_planes*W).  One-time XLA transpose so each
    # kernel block is lane-dense even for small W; inputs stay in their native
    # dtype (the kernel upcasts to f32 in-register).
    x1 = jnp.transpose(img1.reshape(num_planes, H, W), (1, 0, 2)).reshape(H, num_planes * W)
    x2 = jnp.transpose(img2.reshape(num_planes, H, W), (1, 0, 2)).reshape(H, num_planes * W)

    # Banded Gaussian factors with the zero "same" padding baked in.
    gv = _band_matrix(H, window_size, 1.5)                        # (H, H)
    gv5 = np.kron(np.eye(5, dtype=np.float32), gv)                # (5H, 5H)
    gh = _band_matrix(W, window_size, 1.5)                        # (W, W)
    ghb = np.kron(np.eye(cblk, dtype=np.float32), gh)             # (lblk, lblk)

    out = pl.pallas_call(
        _ssim_kernel,
        out_shape=jax.ShapeDtypeStruct((grid_n, 8, 128), jnp.float32),
        grid_spec=pltpu.PrefetchScalarGridSpec(
            num_scalar_prefetch=0,
            grid=(grid_n,),
            in_specs=[
                pl.BlockSpec((H, lblk), lambda g: (0, g)),
                pl.BlockSpec((H, lblk), lambda g: (0, g)),
                # Constant-index factors are tiny after the redesign
                # (<= 256 KiB each), so default double-buffering is negligible.
                pl.BlockSpec((5 * H, 5 * H), lambda g: (0, 0)),
                pl.BlockSpec((lblk, lblk), lambda g: (0, 0)),
            ],
            out_specs=pl.BlockSpec((1, 8, 128), lambda g: (g, 0, 0)),
        ),
        compiler_params=pltpu.CompilerParams(
            # Distinct output block per step -> safe to shard across v7x cores.
            dimension_semantics=("parallel",),
            vmem_limit_bytes=_vmem_limit_bytes(),
        ),
    )(x1, x2, jnp.asarray(gv5), jnp.asarray(ghb))

    ssim_sum = jnp.sum(out[:, 0, 0])
    ssim_mean = ssim_sum / jnp.float32(B * C * H * W)
    return (1.0 - ssim_mean).astype(jnp.float32)


def _ssim_loss_reference(img1, img2, window_size=11):
    """Pure-JAX reference (lax.conv depthwise) mirroring the PyTorch code."""
    B, C, H, W = img1.shape
    pad = window_size // 2
    g1d = _gaussian_1d(window_size, 1.5)
    w2d = jnp.asarray(np.outer(g1d, g1d).astype(np.float32))
    win = jnp.broadcast_to(w2d, (C, 1, window_size, window_size))

    def dwconv(x):
        return lax.conv_general_dilated(
            x, win, window_strides=(1, 1),
            padding=[(pad, pad), (pad, pad)],
            dimension_numbers=("NCHW", "OIHW", "NCHW"),
            feature_group_count=C,
            precision=lax.Precision.HIGHEST)

    img1 = img1.astype(jnp.float32)
    img2 = img2.astype(jnp.float32)
    mu1 = dwconv(img1)
    mu2 = dwconv(img2)
    mu1_sq, mu2_sq, mu1_mu2 = mu1 * mu1, mu2 * mu2, mu1 * mu2
    sigma1_sq = dwconv(img1 * img1) - mu1_sq
    sigma2_sq = dwconv(img2 * img2) - mu2_sq
    sigma12 = dwconv(img1 * img2) - mu1_mu2
    C1, C2 = 0.01**2, 0.03**2
    ssim_map = ((2 * mu1_mu2 + C1) * (2 * sigma12 + C2) /
                ((mu1_sq + mu2_sq + C1) * (sigma1_sq + sigma2_sq + C2)))
    return 1.0 - jnp.mean(ssim_map)


if __name__ == "__main__":
    key = jax.random.PRNGKey(0)
    k1, k2 = jax.random.split(key)
    B, C, H, W = 2, 4, 16, 16
    img1 = jax.random.uniform(k1, (B, C, H, W), dtype=jnp.float32)
    img2 = jax.random.uniform(k2, (B, C, H, W), dtype=jnp.float32)

    loss = jax.block_until_ready(ssim_loss_pallas(img1, img2))
    ref = jax.block_until_ready(_ssim_loss_reference(img1, img2))

    if not np.allclose(np.asarray(loss), np.asarray(ref), rtol=1e-3, atol=1e-3):
        raise AssertionError(f"mismatch: pallas={loss} ref={ref}")

    print("KERNEL_OK")
</pallas_src>

<mosaic_0001>
module attributes {stable_mosaic.version = 11 : i64} {
  func.func @_ssim_kernel(%arg0: i32, %arg1: memref<16x128xf32, #tpu.memory_space<vmem>>, %arg2: memref<16x128xf32, #tpu.memory_space<vmem>>, %arg3: memref<80x80xf32, #tpu.memory_space<vmem>>, %arg4: memref<128x128xf32, #tpu.memory_space<vmem>>, %arg5: memref<1x8x128xf32, #tpu.memory_space<vmem>>) attributes {dimension_semantics = [#tpu.dimension_semantics<parallel>], iteration_bounds = array<i64: 1>, scalar_prefetch = 0 : i64, scratch_operands = 0 : i64, tpu.core_type = #tpu.core_type<tc>, window_params = [{transform_indices = @transform_0, window_bounds = array<i64: 16, 128>}, {transform_indices = @transform_1, window_bounds = array<i64: 16, 128>}, {pipeline_mode = #tpu.pipeline_mode<synchronous>, transform_indices = @transform_2, window_bounds = array<i64: 80, 80>}, {pipeline_mode = #tpu.pipeline_mode<synchronous>, transform_indices = @transform_3, window_bounds = array<i64: 128, 128>}, {transform_indices = @transform_4, window_bounds = array<i64: 1, 8, 128>}]} {
    %c0 = arith.constant 0 : index
    %c0_0 = arith.constant 0 : index
    %0 = vector.load %arg1[%c0, %c0_0] : memref<16x128xf32, #tpu.memory_space<vmem>>, vector<16x128xf32>
    %c0_1 = arith.constant 0 : index
    %c0_2 = arith.constant 0 : index
    %1 = vector.load %arg2[%c0_1, %c0_2] : memref<16x128xf32, #tpu.memory_space<vmem>>, vector<16x128xf32>
    %2 = arith.mulf %0, %0 : vector<16x128xf32>
    %3 = arith.mulf %1, %1 : vector<16x128xf32>
    %4 = arith.mulf %0, %1 : vector<16x128xf32>
    %5 = tpu.concatenate %0, %1, %2, %3, %4 in 0 : vector<16x128xf32>, vector<16x128xf32>, vector<16x128xf32>, vector<16x128xf32>, vector<16x128xf32> -> vector<80x128xf32>
    %c0_3 = arith.constant 0 : index
    %c0_4 = arith.constant 0 : index
    %6 = vector.load %arg4[%c0_3, %c0_4] : memref<128x128xf32, #tpu.memory_space<vmem>>, vector<128x128xf32>
    %cst = arith.constant dense<0.000000e+00> : vector<80x128xf32>
    %7 = tpu.matmul %5, %6, %cst {dimension_numbers = #tpu.dot_dimension_numbers<[1], [0], [0], [1], [0, 0, 1, 1], [], []>} : vector<80x128xf32>, vector<128x128xf32>, vector<80x128xf32> -> vector<80x128xf32>
    %c0_5 = arith.constant 0 : index
    %c0_6 = arith.constant 0 : index
    %8 = vector.load %arg3[%c0_5, %c0_6] : memref<80x80xf32, #tpu.memory_space<vmem>>, vector<80x80xf32>
    %cst_7 = arith.constant dense<0.000000e+00> : vector<80x128xf32>
    %9 = tpu.matmul %8, %7, %cst_7 {dimension_numbers = #tpu.dot_dimension_numbers<[1], [0], [0], [1], [0, 0, 1, 1], [], []>} : vector<80x80xf32>, vector<80x128xf32>, vector<80x128xf32> -> vector<80x128xf32>
    %10 = vector.extract_strided_slice %9 {offsets = [0, 0], sizes = [16, 128], strides = [1, 1]} : vector<80x128xf32> to vector<16x128xf32>
    %11 = vector.extract_strided_slice %9 {offsets = [16, 0], sizes = [16, 128], strides = [1, 1]} : vector<80x128xf32> to vector<16x128xf32>
    %12 = vector.extract_strided_slice %9 {offsets = [32, 0], sizes = [16, 128], strides = [1, 1]} : vector<80x128xf32> to vector<16x128xf32>
    %13 = vector.extract_strided_slice %9 {offsets = [48, 0], sizes = [16, 128], strides = [1, 1]} : vector<80x128xf32> to vector<16x128xf32>
    %14 = vector.extract_strided_slice %9 {offsets = [64, 0], sizes = [16, 128], strides = [1, 1]} : vector<80x128xf32> to vector<16x128xf32>
    %15 = arith.mulf %10, %10 : vector<16x128xf32>
    %16 = arith.mulf %11, %11 : vector<16x128xf32>
    %17 = arith.mulf %10, %11 : vector<16x128xf32>
    %18 = arith.subf %12, %15 : vector<16x128xf32>
    %19 = arith.subf %13, %16 : vector<16x128xf32>
    %20 = arith.subf %14, %17 : vector<16x128xf32>
    %cst_8 = arith.constant 2.000000e+00 : f32
    %21 = vector.broadcast %cst_8 : f32 to vector<16x128xf32>
    %22 = arith.mulf %21, %17 : vector<16x128xf32>
    %cst_9 = arith.constant 9.99999974E-5 : f32
    %23 = vector.broadcast %cst_9 : f32 to vector<16x128xf32>
    %24 = arith.addf %22, %23 : vector<16x128xf32>
    %cst_10 = arith.constant 2.000000e+00 : f32
    %25 = vector.broadcast %cst_10 : f32 to vector<16x128xf32>
    %26 = arith.mulf %25, %20 : vector<16x128xf32>
    %cst_11 = arith.constant 8.99999984E-4 : f32
    %27 = vector.broadcast %cst_11 : f32 to vector<16x128xf32>
    %28 = arith.addf %26, %27 : vector<16x128xf32>
    %29 = arith.mulf %24, %28 : vector<16x128xf32>
    %30 = arith.addf %15, %16 : vector<16x128xf32>
    %cst_12 = arith.constant 9.99999974E-5 : f32
    %31 = vector.broadcast %cst_12 : f32 to vector<16x128xf32>
    %32 = arith.addf %30, %31 : vector<16x128xf32>
    %33 = arith.addf %18, %19 : vector<16x128xf32>
    %cst_13 = arith.constant 8.99999984E-4 : f32
    %34 = vector.broadcast %cst_13 : f32 to vector<16x128xf32>
    %35 = arith.addf %33, %34 : vector<16x128xf32>
    %36 = arith.mulf %32, %35 : vector<16x128xf32>
    %37 = tpu.reciprocal %36 {approx = true} : vector<16x128xf32> -> vector<16x128xf32>
    %38 = arith.mulf %36, %37 : vector<16x128xf32>
    %cst_14 = arith.constant 2.000000e+00 : f32
    %39 = vector.broadcast %cst_14 : f32 to vector<16x128xf32>
    %40 = arith.subf %39, %38 : vector<16x128xf32>
    %41 = arith.mulf %37, %40 : vector<16x128xf32>
    %42 = arith.mulf %29, %41 : vector<16x128xf32>
    %43 = vector.shape_cast %42 : vector<16x128xf32> to vector<1x16x128xf32>
    %cst_15 = arith.constant dense<0.000000e+00> : vector<1xf32>
    %44 = vector.multi_reduction <add>, %43, %cst_15 [1, 2] : vector<1x16x128xf32> to vector<1xf32>
    %45 = vector.shape_cast %44 : vector<1xf32> to vector<1x1x1xf32>
    %46 = vector.extract %45[0, 0, 0] : f32 from vector<1x1x1xf32>
    %47 = vector.broadcast %46 : f32 to vector<1x8x128xf32>
    %c0_16 = arith.constant 0 : index
    %c0_17 = arith.constant 0 : index
    %c0_18 = arith.constant 0 : index
    %48 = vector.load %arg5[%c0_16, %c0_17, %c0_18] : memref<1x8x128xf32, #tpu.memory_space<vmem>>, vector<1x8x128xf32>
    tpu.vector_store %arg5[%c0_16, %c0_17, %c0_18], %47 {strides = array<i32>} : memref<1x8x128xf32, #tpu.memory_space<vmem>>, vector<1x8x128xf32>,
    return
  }
  func.func @transform_0(%arg0: i32) -> (i32, i32) {
    %c0_i32 = arith.constant 0 : i32
    %c0_i32_0 = arith.constant 0 : i32
    return %c0_i32, %arg0 : i32, i32
  }
  func.func @transform_1(%arg0: i32) -> (i32, i32) {
    %c0_i32 = arith.constant 0 : i32
    %c0_i32_0 = arith.constant 0 : i32
    return %c0_i32, %arg0 : i32, i32
  }
  func.func @transform_2(%arg0: i32) -> (i32, i32) {
    %c0_i32 = arith.constant 0 : i32
    %c0_i32_0 = arith.constant 0 : i32
    %c0_i32_1 = arith.constant 0 : i32
    return %c0_i32, %c0_i32_0 : i32, i32
  }
  func.func @transform_3(%arg0: i32) -> (i32, i32) {
    %c0_i32 = arith.constant 0 : i32
    %c0_i32_0 = arith.constant 0 : i32
    %c0_i32_1 = arith.constant 0 : i32
    return %c0_i32, %c0_i32_0 : i32, i32
  }
  func.func @transform_4(%arg0: i32) -> (i32, i32, i32) {
    %c0_i32 = arith.constant 0 : i32
    %c0_i32_0 = arith.constant 0 : i32
    %c0_i32_1 = arith.constant 0 : i32
    return %arg0, %c0_i32, %c0_i32_0 : i32, i32, i32
  }
}

</mosaic_0001>

<bundles_post_ra>
// kernel: tpu_custom_call.1
= control target key start
LH: loop header
LB: loop body
LE: loop exit
PB: predicated region body
PF: predicated region fallthrough
CT: control target
= control target key end

     0   :  { %9 = vsyncpa [#allocation3], 0  ;;  %s549_s0 = inlined_call_operand.hbm [shape: f32[16,128], index: 0, kind: input, shape index: {}]   ;;  %s550_s1 = inlined_call_operand.hbm [shape: f32[16,128], index: 1, kind: input, shape index: {}]   ;;  %s551_s2 = inlined_call_operand.hbm [shape: f32[80,80], index: 2, kind: input, shape index: {}]   ;;  %s552_s3 = inlined_call_operand.hbm [shape: f32[128,128], index: 3, kind: input, shape index: {}]   ;;  %s553_s4 = inlined_call_operand.hbm [shape: f32[1,8,128], index: 4, kind: output, shape index: {}]  }
   0x1   :  { %10 = vsyncpa [#allocation6], 0 }
   0x2   :  { %11 = vsyncpa [#allocation9], 0 }
   0x3   :  { %12 = vsyncpa [#allocation4], 0  ;;  %s30_s17 = sshll.u32 %s550_s1, 4  ;;  %s492_s18 = smov [#allocation5]   ;;  %s31_s17 = int_to_ptr.hbm [resolvable:$true] %s30_s17 }
   0x4   :  { %s32_s19 = sshll.u32 %s492_s18, 4  ;;  %s17_s22 = sshll.u32 %s549_s0, 4  ;;  %s33_s19 = int_to_ptr.vmem [resolvable:$true] %s32_s19  ;;  %s18_s22 = int_to_ptr.hbm [resolvable:$true] %s17_s22 }
   0x5   :  { %s493_s23 = smov 128   ;;  %s494_s24 = smov 8  }
   0x6   :  { %38 = dma.hbm_to_vmem [thread:$0]  %s31_s17, 256, %s33_s19, [#allocation6], %s493_s23, %s493_s23, %s494_s24  }
   0x7   :  { %s495_s25 = smov [#allocation2]   ;;  %s43_s29 = sshll.u32 %s551_s2, 4  ;;  %s44_s29 = int_to_ptr.hbm [resolvable:$true] %s43_s29 }
   0x8   :  { %s19_s26 = sshll.u32 %s495_s25, 4  ;;  %s56_s5 = sshll.u32 %s552_s3, 4  ;;  %s20_s26 = int_to_ptr.vmem [resolvable:$true] %s19_s26  ;;  %s57_s5 = int_to_ptr.hbm [resolvable:$true] %s56_s5 }
   0x9   :  { %25 = dma.hbm_to_vmem [thread:$0]  %s18_s22, 256, %s20_s26, [#allocation3], %s493_s23, %s493_s23, %s494_s24  }
   0xa   :  { %s496_s6 = smov [#allocation7]   ;;  %s497_s0 = smov [#allocation8]  }
   0xb   :  { %s45_s7 = sshll.u32 %s496_s6, 4  ;;  %s58_s8 = sshll.u32 %s497_s0, 4  ;;  %s46_s7 = int_to_ptr.vmem [resolvable:$true] %s45_s7  ;;  %s59_s8 = int_to_ptr.vmem [resolvable:$true] %s58_s8 }
   0xc   :  { %51 = dma.hbm_to_vmem [thread:$0]  %s44_s29, 1280, %s46_s7, [#allocation6], %s493_s23, %s493_s23, %s494_s24  }
   0xd   :  { %64 = dma.hbm_to_vmem [thread:$0]  %s57_s5, 2048, %s59_s8, [#allocation9], %s493_s23, %s493_s23, %s494_s24  }
   0xe   :  { %484 = dma.done.wait [#allocation3], 256  }
   0xf   :  { %485 = vsyncadd [#allocation3], 4294967040 }
  0x10   :  { %486 = dma.done.wait [#allocation6], 1536  }
  0x11   :  { %487 = vsyncadd [#allocation6], 4294965760 }
  0x12   :  { %488 = dma.done.wait [#allocation9], 2048  }
  0x13   :  { %489 = vsyncadd [#allocation9], 4294965248  ;;  %v106_v0 = vld [vmem:[#allocation8 + $0x78] sm:$0xff]  ;;  %v105_v1 = vld [vmem:[#allocation8 + $0x70] sm:$0xff]  ;;  %vm164_vm0 = vcmask 654336   ;;  %s498_s2 = smov [#allocation10]  }
  0x14   :  { %325 = vmatpush.msra.mxu2 %v106_v0  ;;  %107 = vmatpush.msra.mxu0 %v106_v0  ;;  %v104_v2 = vld [vmem:[#allocation8 + $0x68] sm:$0xff]  ;;  %v103_v3 = vld [vmem:[#allocation8 + $0x60] sm:$0xff]  ;;  %v102_v4 = vld [vmem:[#allocation8 + $0x58] sm:$0xff]  ;;  %s301_s3 = sshll.u32 %s498_s2, 4  ;;  %s303_s11 = sshll.u32 %s553_s4, 4  ;;  %s302_s3 = int_to_ptr.vmem [resolvable:$true] %s301_s3  ;;  %s304_s11 = int_to_ptr.hbm [resolvable:$true] %s303_s11 }
  0x15   :  { %v101_v5 = vld [vmem:[#allocation8 + $0x50] sm:$0xff]  ;;  %v100_v6 = vld [vmem:[#allocation8 + $0x48] sm:$0xff]  ;;  %v99_v7 = vld [vmem:[#allocation8 + $0x40] sm:$0xff] }
  0x16   :  { %326 = vmatpush.msra.mxu2 %v105_v1  ;;  %108 = vmatpush.msra.mxu0 %v105_v1  ;;  %v98_v8 = vld [vmem:[#allocation8 + $0x38] sm:$0xff]  ;;  %v97_v9 = vld [vmem:[#allocation8 + $0x30] sm:$0xff]  ;;  %v96_v10 = vld [vmem:[#allocation8 + $0x28] sm:$0xff] }
  0x17   :  { %v95_v11 = vld [vmem:[#allocation8 + $0x20] sm:$0xff]  ;;  %v94_v12 = vld [vmem:[#allocation8 + $0x18] sm:$0xff]  ;;  %v93_v13 = vld [vmem:[#allocation8 + $0x10] sm:$0xff] }
  0x18   :  { %327 = vmatpush.msra.mxu2 %v104_v2  ;;  %109 = vmatpush.msra.mxu0 %v104_v2  ;;  %v81_v14 = vld [vmem:[#allocation2] sm:$0xff]  ;;  %v92_v15 = vld [vmem:[#allocation8 + $0x8] sm:$0xff]  ;;  %v91_v16 = vld [vmem:[#allocation8] sm:$0xff] }
  0x19   :  { %v85_v17 = vmul.f32 %v81_v14, %v81_v14  ;;  %v82_v18 = vld [vmem:[#allocation2 + $0x8] sm:$0xff]  ;;  %v83_v20 = vld [vmem:[#allocation5] sm:$0xff]  ;;  %v84_v22 = vld [vmem:[#allocation5 + $0x8] sm:$0xff] }
  0x1a   :  { %328 = vmatpush.msra.mxu2 %v103_v3  ;;  %110 = vmatpush.msra.mxu0 %v103_v3  ;;  %v86_v19 = vmul.f32 %v82_v18, %v82_v18  ;;  %v87_v21 = vmul.f32 %v83_v20, %v83_v20  ;;  %v88_v23 = vmul.f32 %v84_v22, %v84_v22  ;;  %v154_v36 = vld [vmem:[#allocation7] sm:$0xff]  ;;  %v160_v37 = vld [vmem:[#allocation7 + $0x30] sm:$0xff]  ;;  %v155_v38 = vld [vmem:[#allocation7 + $0x8] sm:$0xff] }
  0x1b   :  { %v89_v24 = vmul.f32 %v83_v20, %v81_v14  ;;  %v90_v25 = vmul.f32 %v84_v22, %v82_v18  ;;  %v161_v39 = vld [vmem:[#allocation7 + $0x38] sm:$0xff]  ;;  %v156_v40 = vld [vmem:[#allocation7 + $0x10] sm:$0xff]  ;;  %v162_v41 = vld [vmem:[#allocation7 + $0x40] sm:$0xff] }
  0x1c   :  { %329 = vmatpush.msra.mxu2 %v102_v4  ;;  %111 = vmatpush.msra.mxu0 %v102_v4  ;;  %v157_v42 = vld [vmem:[#allocation7 + $0x18] sm:$0xff]  ;;  %v163_v43 = vld [vmem:[#allocation7 + $0x48] sm:$0xff]  ;;  %v158_v44 = vld [vmem:[#allocation7 + $0x20] sm:$0xff] }
  0x1d   :  { %v159_v45 = vld [vmem:[#allocation7 + $0x28] sm:$0xff] }
  0x1e   :  { %330 = vmatpush.msra.mxu2 %v101_v5  ;;  %112 = vmatpush.msra.mxu0 %v101_v5 }
  0x20   :  { %331 = vmatpush.msra.mxu2 %v100_v6  ;;  %113 = vmatpush.msra.mxu0 %v100_v6 }
  0x22   :  { %332 = vmatpush.msra.mxu2 %v99_v7  ;;  %114 = vmatpush.msra.mxu0 %v99_v7 }
  0x24   :  { %333 = vmatpush.msra.mxu2 %v98_v8  ;;  %115 = vmatpush.msra.mxu0 %v98_v8 }
  0x26   :  { %334 = vmatpush.msra.mxu2 %v97_v9  ;;  %116 = vmatpush.msra.mxu0 %v97_v9 }
  0x28   :  { %335 = vmatpush.msra.mxu2 %v96_v10  ;;  %117 = vmatpush.msra.mxu0 %v96_v10 }
  0x2a   :  { %336 = vmatpush.msra.mxu2 %v95_v11  ;;  %118 = vmatpush.msra.mxu0 %v95_v11 }
  0x2c   :  { %337 = vmatpush.msra.mxu2 %v94_v12  ;;  %119 = vmatpush.msra.mxu0 %v94_v12 }
  0x2e   :  { %338 = vmatpush.msra.mxu2 %v93_v13  ;;  %120 = vmatpush.msra.mxu0 %v93_v13 }
  0x30   :  { %339 = vmatpush.msra.mxu2 %v92_v15  ;;  %121 = vmatpush.msra.mxu0 %v92_v15 }
  0x32   :  { %340 = vmatpush.msra.mxu2 %v91_v16  ;;  %122 = vmatpush.msra.mxu0 %v91_v16 }
  0x33   :  { %135 = vmatmul.f32.vlgmr.msra.gmra.mxu2 %v85_v17  ;;  %123 = vmatmul.f32.vlgmr.msra.gmra.mxu0 %v81_v14 }
  0x3b   :  { %138 = vmatmul.f32.gmra.mxu2 %v86_v19  ;;  %126 = vmatmul.f32.gmra.mxu0 %v82_v18 }
  0x43   :  { %141 = vmatmul.f32.gmra.mxu2 %v87_v21  ;;  %129 = vmatmul.f32.gmra.mxu0 %v83_v20 }
  0x4b   :  { %144 = vmatmul.f32.gmra.mxu2 %v88_v23  ;;  %132 = vmatmul.f32.gmra.mxu0 %v84_v22 }
  0x53   :  { %147 = vmatmul.f32.gmra.mxu2 %v89_v24 }
  0x5b   :  { %150 = vmatmul.f32.gmra.mxu2 %v90_v25 }
  0xb0   :  { %v124_v29 = vpop.f32.mrf.mxu0 }
  0xb6   :  { %v136_v26 = vpop.f32.mrf.mxu2 }
  0xb8   :  { %v127_v31 = vpop.f32.mrf.mxu0 }
  0xbe   :  { %v139_v27 = vpop.f32.mrf.mxu2 }
  0xc0   :  { %v130_v34 = vpop.f32.mrf.mxu0 }
  0xc6   :  { %v142_v28 = vpop.f32.mrf.mxu2 }
  0xc8   :  { %v133_v35 = vpop.f32.mrf.mxu0 }
  0xce   :  { %v145_v30 = vpop.f32.mrf.mxu2 }
  0xd6   :  { %v148_v32 = vpop.f32.mrf.mxu2 }
  0xde   :  { %v151_v33 = vpop.f32.mrf.mxu2 }
  0xdf   :  { %201 = vmatpush.msra.mxu1 %v151_v33  ;;  %341 = vmatpush.msra.mxu3 %v151_v33 }
  0xe1   :  { %202 = vmatpush.msra.mxu1 %v148_v32  ;;  %342 = vmatpush.msra.mxu3 %v148_v32 }
  0xe3   :  { %203 = vmatpush.msra.mxu1 %v145_v30  ;;  %343 = vmatpush.msra.mxu3 %v145_v30 }
  0xe5   :  { %204 = vmatpush.msra.mxu1 %v142_v28  ;;  %344 = vmatpush.msra.mxu3 %v142_v28 }
  0xe7   :  { %205 = vmatpush.msra.mxu1 %v139_v27  ;;  %345 = vmatpush.msra.mxu3 %v139_v27 }
  0xe9   :  { %206 = vmatpush.msra.mxu1 %v136_v26  ;;  %346 = vmatpush.msra.mxu3 %v136_v26 }
  0xeb   :  { %207 = vmatpush.msra.mxu1 %v133_v35  ;;  %347 = vmatpush.msra.mxu3 %v133_v35 }
  0xed   :  { %208 = vmatpush.msra.mxu1 %v130_v34  ;;  %348 = vmatpush.msra.mxu3 %v130_v34 }
  0xef   :  { %209 = vmatpush.msra.mxu1 %v127_v31  ;;  %349 = vmatpush.msra.mxu3 %v127_v31 }
  0xf1   :  { %210 = vmatpush.msra.mxu1 %v124_v29  ;;  %350 = vmatpush.msra.mxu3 %v124_v29 }
  0xf2   :  { %315 = vmatmul.msk.f32.vlgmr.msra.gmra.mxu1 %vm164_vm0, %v154_v36  ;;  %321 = vmatmul.msk.f32.vlgmr.msra.gmra.mxu3 %vm164_vm0, %v160_v37 }
  0xfa   :  { %316 = vmatmul.msk.f32.gmra.mxu1 %vm164_vm0, %v155_v38  ;;  %322 = vmatmul.msk.f32.gmra.mxu3 %vm164_vm0, %v161_v39 }
 0x102   :  { %317 = vmatmul.msk.f32.gmra.mxu1 %vm164_vm0, %v156_v40  ;;  %323 = vmatmul.msk.f32.gmra.mxu3 %vm164_vm0, %v162_v41 }
 0x10a   :  { %318 = vmatmul.msk.f32.gmra.mxu1 %vm164_vm0, %v157_v42  ;;  %324 = vmatmul.msk.f32.gmra.mxu3 %vm164_vm0, %v163_v43 }
 0x112   :  { %319 = vmatmul.msk.f32.gmra.mxu1 %vm164_vm0, %v158_v44 }
 0x11a   :  { %320 = vmatmul.msk.f32.gmra.mxu1 %vm164_vm0, %v159_v45 }
 0x16f   :  { %v212_v46 = vpop.f32.mrf.mxu1 }
 0x170   :  { %v242_v53 = vmul.f32 %v212_v46, %v212_v46 }
 0x175   :  { %v230_v48 = vpop.f32.mrf.mxu3 }
 0x177   :  { %v215_v47 = vpop.f32.mrf.mxu1 }
 0x178   :  { %v243_v63 = vmul.f32 %v215_v47, %v215_v47 }
 0x17d   :  { %v233_v51 = vpop.f32.mrf.mxu3 }
 0x17f   :  { %v218_v49 = vpop.f32.mrf.mxu1 }
 0x180   :  { %v244_v52 = vmul.f32 %v218_v49, %v218_v49  ;;  %v246_v9 = vmul.f32 %v218_v49, %v212_v46 }
 0x182   :  { %v250_v55 = vsub.f32 %v230_v48, %v244_v52  ;;  %v264_v56 = vadd.f32 %v244_v52, %v242_v53  ;;  %v254_v18 = vmul.f32 2.0, %v246_v9 }
 0x184   :  { %v266_v60 = vadd.f32 0.0001, %v264_v56  ;;  %v256_v25 = vadd.f32 0.0001, %v254_v18 }
 0x185   :  { %v236_v58 = vpop.f32.mrf.mxu3 }
 0x186   :  { %v252_v13 = vsub.f32 %v236_v58, %v246_v9 }
 0x187   :  { %v221_v50 = vpop.f32.mrf.mxu1 }
 0x188   :  { %v245_v61 = vmul.f32 %v221_v50, %v221_v50  ;;  %v247_v10 = vmul.f32 %v221_v50, %v215_v47  ;;  %v258_v16 = vmul.f32 2.0, %v252_v13 }
 0x18a   :  { %v251_v2 = vsub.f32 %v233_v51, %v245_v61  ;;  %v265_v3 = vadd.f32 %v245_v61, %v243_v63  ;;  %v255_v19 = vmul.f32 2.0, %v247_v10  ;;  %v260_v22 = vadd.f32 0.0009, %v258_v16 }
 0x18c   :  { %v267_v6 = vadd.f32 0.0001, %v265_v3  ;;  %v257_v26 = vadd.f32 0.0001, %v255_v19  ;;  %v262_v29 = vmul.f32 %v260_v22, %v256_v25 }
 0x18d   :  { %v239_v7 = vpop.f32.mrf.mxu3 }
 0x18e   :  { %v253_v14 = vsub.f32 %v239_v7, %v247_v10 }
 0x18f   :  { %v224_v54 = vpop.f32.mrf.mxu1 }
 0x190   :  { %v248_v57 = vsub.f32 %v224_v54, %v242_v53  ;;  %v259_v17 = vmul.f32 2.0, %v253_v14 }
 0x192   :  { %v268_v59 = vadd.f32 %v250_v55, %v248_v57  ;;  %v261_v23 = vadd.f32 0.0009, %v259_v17 }
 0x194   :  { %v270_v62 = vadd.f32 0.0009, %v268_v59  ;;  %v263_v30 = vmul.f32 %v261_v23, %v257_v26 }
 0x196   :  { %v272_v0 = vmul.f32 %v270_v62, %v266_v60 }
 0x197   :  { %v227_v1 = vpop.f32.mrf.mxu1 }
 0x198   :  { %360 = vrcp.f32 %v272_v0  ;;  %v249_v4 = vsub.f32 %v227_v1, %v243_v63 }
 0x19a   :  { %v269_v5 = vadd.f32 %v251_v2, %v249_v4 }
 0x19c   :  { %v271_v8 = vadd.f32 0.0009, %v269_v5 }
 0x19e   :  { %v361_v11 = vpop.eup %360  ;;  %v273_v12 = vmul.f32 %v271_v8, %v267_v6 }
 0x19f   :  { %v276_v15 = vmul.f32 %v361_v11, %v272_v0 }
 0x1a0   :  { %362 = vrcp.f32 %v273_v12 }
 0x1a1   :  { %v278_v20 = vsub.f32 2.0, %v276_v15 }
 0x1a3   :  { %v280_v28 = vmul.f32 %v361_v11, %v278_v20 }
 0x1a5   :  { %v282_v32 = vmul.f32 %v280_v28, %v262_v29 }
 0x1a6   :  { %v363_v21 = vpop.eup %362 }
 0x1a7   :  { %v277_v24 = vmul.f32 %v363_v21, %v273_v12 }
 0x1a9   :  { %v279_v27 = vsub.f32 2.0, %v277_v24 }
 0x1ab   :  { %v281_v31 = vmul.f32 %v363_v21, %v279_v27 }
 0x1ad   :  { %v283_v33 = vmul.f32 %v281_v31, %v263_v30 }
 0x1af   :  { %v284_v34 = vadd.f32 %v283_v33, %v282_v32 }
 0x1b1   :  { %285 = vadd.xlane.f32.xlu0 %v284_v34 }
 0x224   :  { %v286_v35 = vpop.xlane.xlu0 %285 }
 0x225   :  { %v287_v36 = vrot.slane %v286_v35, 4 }
 0x227   :  { %v288_v37 = vadd.f32 %v287_v36, %v286_v35 }
 0x229   :  { %v289_v38 = vrot.slane %v288_v37, 2 }
 0x22b   :  { %v290_v39 = vadd.f32 %v289_v38, %v288_v37 }
 0x22d   :  { %v291_v40 = vrot.slane %v290_v39, 1 }
 0x22f   :  { %v292_v41 = vadd.f32 %v291_v40, %v290_v39 }
 0x231   :  { %351 = vpush %v292_v41 }
 0x262   :  { %s352_s12 = spop %351 }
 0x263   :  { %v294_v42 = vstv %s352_s12 }
 0x264   :  { %295 = vst [vmem:[#allocation10] sm:$0xff] %v294_v42 }
 0x265   :  { %306 = dma.vmem_to_hbm [thread:$0]  %s302_s3, 128, %s304_s11, [#allocation4]  }
 0x266   :  { %490 = dma.done.wait [#allocation4], 128  }
 0x267   :  { %491 = vsyncadd [#allocation4], 4294967168 }
 0x268   :  { %311 = vsyncpa [#allocation3], 1 }
 0x269   :  { %312 = vsyncpa [#allocation6], 1 }
 0x26a   :  { %313 = vsyncpa [#allocation9], 1 }
 0x26b   :  { %314 = vsyncpa [#allocation4], 1 }

</bundles_post_ra>
